<compile_context>
chip_gen: v7x
topology: tpu7x:2x2x1
jax: 0.10.0
libtpu: 0.0.40
codegen_flags: <defaults>
</compile_context>

<pallas_src>
import functools

import jax
import jax.numpy as jnp
from jax import lax
from jax.experimental import pallas as pl
from jax.experimental.pallas import tpu as pltpu


def _attn_kernel(x_ref, w_ref, b_ref, ctx_ref, attw_ref, *, chunk_b):
    # x_ref:    (TB, S, H) VMEM  input slab (TB batch rows)
    # w_ref:    (1, H)     VMEM  lane-dense Linear weight row
    # b_ref:    (1,)       SMEM  Linear bias scalar
    # ctx_ref:  (TB, H)    VMEM  context output
    # attw_ref: (TB, S)    VMEM  attention weights (lane-dense; reshaped to
    #                             (B, S, 1) in the wrapper)
    w = w_ref[...].astype(jnp.float32)          # (1, H)
    b = b_ref[0].astype(jnp.float32)            # scalar
    n_chunks = x_ref.shape[0] // chunk_b

    def body(c, carry):
        i0 = pl.multiple_of(c * chunk_b, chunk_b)
        x = x_ref[pl.ds(i0, chunk_b)].astype(jnp.float32)       # (CB, S, H)

        # Linear(H, 1): VPU multiply + XLU lane reduction (no width-1 MXU op).
        scores = jnp.sum(x * w, axis=-1) + b                    # (CB, S)

        # softmax over the sequence axis (dim=1 of the original (B, S, 1)).
        m = jnp.max(scores, axis=-1, keepdims=True)             # (CB, 1)
        e = jnp.exp(scores - m)                                 # (CB, S)
        denom = jnp.sum(e, axis=-1, keepdims=True)              # (CB, 1)
        weights = e / denom                                     # (CB, S)

        # context = sum over seq of weights * x  -> (CB, H)
        ctx = jnp.sum(weights[:, :, None] * x, axis=1)          # (CB, H)

        ctx_ref[pl.ds(i0, chunk_b), :] = ctx.astype(ctx_ref.dtype)
        attw_ref[pl.ds(i0, chunk_b), :] = weights.astype(attw_ref.dtype)
        return carry

    lax.fori_loop(0, n_chunks, body, 0, unroll=True)


def _choose_tiles(B, S, H, itemsize):
    """Pick (batch tile per grid step, batch chunk per inner loop iter)."""
    per_b = max(S * H * itemsize, 1)
    # Inner-loop chunk: ~128 KiB of input keeps live values near the vreg file.
    cb = max(1, min(B, (128 * 1024) // per_b))
    while B % cb:
        cb -= 1
    # Grid tile: ~2 MiB per step (double-buffered input fits v7x VMEM easily);
    # keep >=2 grid steps when possible so the "parallel" batch axis can be
    # sharded across TensorCores on v7x.
    tb = max(cb, min(B, (2 * 1024 * 1024) // per_b))
    if B >= 2 * cb:
        tb = min(tb, B // 2)
    tb = max(cb, (tb // cb) * cb)
    while B % tb:
        tb -= cb
    return tb, cb


def attention_forward(lstm_output, weight, bias):
    """lstm_output: (B, S, H); weight: (1, H) torch-layout; bias: (1,)."""
    B, S, H = lstm_output.shape
    dt = lstm_output.dtype
    tb, cb = _choose_tiles(B, S, H, jnp.dtype(dt).itemsize)

    w_row = weight.reshape(1, H)       # keep lane-dense (1, H) layout
    b_smem = bias.reshape(1)           # true scalar -> SMEM

    kernel = functools.partial(_attn_kernel, chunk_b=cb)

    ctx, attw = pl.pallas_call(
        kernel,
        out_shape=(
            jax.ShapeDtypeStruct((B, H), dt),    # context_vector
            jax.ShapeDtypeStruct((B, S), dt),    # attention weights, lane-dense
        ),
        grid=(B // tb,),
        in_specs=[
            pl.BlockSpec((tb, S, H), lambda i: (i, 0, 0)),          # x slab
            pl.BlockSpec((1, H), lambda i: (0, 0)),                 # weight row
            pl.BlockSpec(memory_space=pltpu.MemorySpace.SMEM),      # bias scalar
        ],
        out_specs=(
            pl.BlockSpec((tb, H), lambda i: (i, 0)),                # context
            pl.BlockSpec((tb, S), lambda i: (i, 0)),                # weights
        ),
        compiler_params=pltpu.CompilerParams(
            dimension_semantics=("parallel",),
            vmem_limit_bytes=32 * 1024 * 1024,
        ),
    )(lstm_output, w_row, b_smem)

    # Wrapper-side reshape to the module's (B, S, 1) layout (free plumbing).
    return ctx, attw.reshape(B, S, 1)


def attention_reference(lstm_output, weight, bias):
    # Pure-JAX reference replicating the PyTorch forward exactly.
    scores = jnp.einsum("bsh,oh->bso", lstm_output, weight) + bias  # (B, S, 1)
    attw = jax.nn.softmax(scores, axis=1)
    ctx = jnp.sum(attw * lstm_output, axis=1)
    return ctx, attw


if __name__ == "__main__":
    B, S, H = 2, 8, 32  # batch, seq, hidden_size

    key = jax.random.PRNGKey(0)
    kx, kw, kb = jax.random.split(key, 3)

    lstm_output = jax.random.normal(kx, (B, S, H), dtype=jnp.float32)
    # nn.Linear(hidden_size, 1): weight (1, H), bias (1,) -- deterministic init
    bound = 1.0 / (H ** 0.5)
    weight = jax.random.uniform(kw, (1, H), minval=-bound, maxval=bound,
                                dtype=jnp.float32)
    bias = jax.random.uniform(kb, (1,), minval=-bound, maxval=bound,
                              dtype=jnp.float32)

    ctx, attw = attention_forward(lstm_output, weight, bias)
    jax.block_until_ready((ctx, attw))

    ctx_ref, attw_ref = attention_reference(lstm_output, weight, bias)
    assert ctx.shape == (B, H) and attw.shape == (B, S, 1)
    assert jnp.allclose(ctx, ctx_ref, atol=1e-5, rtol=1e-5)
    assert jnp.allclose(attw, attw_ref, atol=1e-5, rtol=1e-5)

    print("KERNEL_OK")
</pallas_src>

<mosaic_0001>
module attributes {stable_mosaic.version = 11 : i64} {
  func.func @_attn_kernel(%arg0: i32, %arg1: memref<2x8x32xf32, #tpu.memory_space<vmem>>, %arg2: memref<1x32xf32, #tpu.memory_space<vmem>>, %arg3: memref<1xf32, #tpu.memory_space<smem>>, %arg4: memref<2x32xf32, #tpu.memory_space<vmem>>, %arg5: memref<2x8xf32, #tpu.memory_space<vmem>>) attributes {dimension_semantics = [#tpu.dimension_semantics<parallel>], iteration_bounds = array<i64: 1>, scalar_prefetch = 0 : i64, scratch_operands = 0 : i64, tpu.core_type = #tpu.core_type<tc>, window_params = [{transform_indices = @transform_0, window_bounds = array<i64: 2, 8, 32>}, {pipeline_mode = #tpu.pipeline_mode<synchronous>, transform_indices = @transform_1, window_bounds = array<i64: 1, 32>}, {transform_indices = @transform_2, window_bounds = array<i64: 1>}, {transform_indices = @transform_3, window_bounds = array<i64: 2, 32>}, {transform_indices = @transform_4, window_bounds = array<i64: 2, 8>}]} {
    %c0 = arith.constant 0 : index
    %c0_0 = arith.constant 0 : index
    %0 = vector.load %arg2[%c0, %c0_0] : memref<1x32xf32, #tpu.memory_space<vmem>>, vector<1x32xf32>
    %c0_1 = arith.constant 0 : index
    %1 = memref.load %arg3[%c0_1] : memref<1xf32, #tpu.memory_space<smem>>
    %c0_i32 = arith.constant 0 : i32
    %c2_i32 = arith.constant 2 : i32
    %2 = arith.muli %c0_i32, %c2_i32 : i32
    %3 = tpu.assume_multiple %2, 2 : i32
    %4 = arith.index_cast %3 : i32 to index
    %c0_2 = arith.constant 0 : index
    %c0_3 = arith.constant 0 : index
    %5 = vector.load %arg1[%4, %c0_2, %c0_3] : memref<2x8x32xf32, #tpu.memory_space<vmem>>, vector<2x8x32xf32>
    %6 = vector.shape_cast %0 : vector<1x32xf32> to vector<1x1x32xf32>
    %7 = vector.broadcast %6 : vector<1x1x32xf32> to vector<2x8x32xf32>
    %8 = arith.mulf %5, %7 : vector<2x8x32xf32>
    %cst = arith.constant dense<0.000000e+00> : vector<2x8xf32>
    %9 = vector.multi_reduction <add>, %8, %cst [2] : vector<2x8x32xf32> to vector<2x8xf32>
    %10 = vector.broadcast %1 : f32 to vector<2x8xf32>
    %11 = arith.addf %9, %10 : vector<2x8xf32>
    %cst_4 = arith.constant dense<0xFF800000> : vector<2xf32>
    %12 = vector.multi_reduction <maximumf>, %11, %cst_4 [1] : vector<2x8xf32> to vector<2xf32>
    %13 = vector.shape_cast %12 : vector<2xf32> to vector<2x1xf32>
    %14 = vector.broadcast %13 : vector<2x1xf32> to vector<2x8xf32>
    %15 = arith.subf %11, %14 : vector<2x8xf32>
    %16 = math.exp %15 : vector<2x8xf32>
    %cst_5 = arith.constant dense<0.000000e+00> : vector<2xf32>
    %17 = vector.multi_reduction <add>, %16, %cst_5 [1] : vector<2x8xf32> to vector<2xf32>
    %18 = vector.shape_cast %17 : vector<2xf32> to vector<2x1xf32>
    %19 = vector.broadcast %18 : vector<2x1xf32> to vector<2x8xf32>
    %20 = arith.divf %16, %19 : vector<2x8xf32>
    %21 = vector.shape_cast %20 : vector<2x8xf32> to vector<2x8x1xf32>
    %22 = vector.broadcast %21 : vector<2x8x1xf32> to vector<2x8x32xf32>
    %23 = arith.mulf %22, %5 : vector<2x8x32xf32>
    %cst_6 = arith.constant dense<0.000000e+00> : vector<2x32xf32>
    %24 = vector.multi_reduction <add>, %23, %cst_6 [1] : vector<2x8x32xf32> to vector<2x32xf32>
    %25 = arith.index_cast %3 : i32 to index
    %c0_7 = arith.constant 0 : index
    %26 = vector.load %arg4[%25, %c0_7] : memref<2x32xf32, #tpu.memory_space<vmem>>, vector<2x32xf32>
    tpu.vector_store %arg4[%25, %c0_7], %24 {strides = array<i32>} : memref<2x32xf32, #tpu.memory_space<vmem>>, vector<2x32xf32>,
    %27 = arith.index_cast %3 : i32 to index
    %c0_8 = arith.constant 0 : index
    %28 = vector.load %arg5[%27, %c0_8] : memref<2x8xf32, #tpu.memory_space<vmem>>, vector<2x8xf32>
    tpu.vector_store %arg5[%27, %c0_8], %20 {strides = array<i32>} : memref<2x8xf32, #tpu.memory_space<vmem>>, vector<2x8xf32>,
    %c1_i32 = arith.constant 1 : i32
    return
  }
  func.func @transform_0(%arg0: i32) -> (i32, i32, i32) {
    %c0_i32 = arith.constant 0 : i32
    %c0_i32_0 = arith.constant 0 : i32
    %c0_i32_1 = arith.constant 0 : i32
    return %arg0, %c0_i32, %c0_i32_0 : i32, i32, i32
  }
  func.func @transform_1(%arg0: i32) -> (i32, i32) {
    %c0_i32 = arith.constant 0 : i32
    %c0_i32_0 = arith.constant 0 : i32
    %c0_i32_1 = arith.constant 0 : i32
    return %c0_i32, %c0_i32_0 : i32, i32
  }
  func.func @transform_2(%arg0: i32) -> i32 {
    %c0_i32 = arith.constant 0 : i32
    %c0_i32_0 = arith.constant 0 : i32
    return %c0_i32 : i32
  }
  func.func @transform_3(%arg0: i32) -> (i32, i32) {
    %c0_i32 = arith.constant 0 : i32
    %c0_i32_0 = arith.constant 0 : i32
    return %arg0, %c0_i32 : i32, i32
  }
  func.func @transform_4(%arg0: i32) -> (i32, i32) {
    %c0_i32 = arith.constant 0 : i32
    %c0_i32_0 = arith.constant 0 : i32
    return %arg0, %c0_i32 : i32, i32
  }
}

</mosaic_0001>

<bundles_post_ra>
// kernel: tpu_custom_call.1
= control target key start
LH: loop header
LB: loop body
LE: loop exit
PB: predicated region body
PF: predicated region fallthrough
CT: control target
= control target key end

     0   :  { %11 = vsyncpa [#allocation4], 0  ;;  %s378_s0 = inlined_call_operand.hbm [shape: f32[2,8,32], index: 0, kind: input, shape index: {}]   ;;  %s379_s1 = inlined_call_operand.vmem [shape: f32[1,32], index: 1, kind: input, shape index: {}]   ;;  %s380_s2 = inlined_call_operand.<no memory space> [shape: f32[1], index: 2, kind: input, shape index: {}]   ;;  %s381_s3 = inlined_call_operand.hbm [shape: f32[2,32], index: 3, kind: output, shape index: {0}]   ;;  %s382_s4 = inlined_call_operand.hbm [shape: f32[2,8], index: 4, kind: output, shape index: {1}]  }
   0x1   :  { %12 = vsyncpa [#allocation5], 0 }
   0x2   :  { %13 = vsyncpa [#allocation8], 0  ;;  %s290_s15 = smov [#allocation3]   ;;  %s218_s19 = scalar_lea.hbm %s378_s0, 256 }
   0x3   :  { %s19_s16 = sshll.u32 %s290_s15, 4  ;;  %p219_p0 = scmp.ne.s32.totalorder %s378_s0, %s218_s19  ;;  %s20_s16 = int_to_ptr.vmem [resolvable:$true] %s19_s16 }
   0x4   :  { %p222_p1 = scmp.lt.u32.totalorder %s218_s19, %s378_s0 }
   0x6   :  { %p224_p2 = pnand %p222_p1, %p219_p0 }
   0x8   :  { %227 = shalt.err (!%p224_p2)
}
   0x9   :  { %s228_s24 = scalar_lea.vmem %s20_s16, 256  ;;  %p233_p4 = scmp.lt.s32.totalorder %s20_s16, %s20_s16 }
   0xa   :  { %p229_p3 = scmp.ne.s32.totalorder %s20_s16, %s228_s24  ;;  %p234_p5 = scmp.lt.s32.totalorder %s228_s24, %s228_s24 }
   0xc   :  { %p235_p6 = por %p234_p5, %p233_p4 }
   0xe   :  { %p236_p7 = pnand %p235_p6, %p229_p3 }
  0x10   :  { %239 = shalt.err (!%p236_p7)
}
  0x11   :  { %s291_s25 = smov 128   ;;  %s292_s26 = smov 8  }
  0x12   :  { %25 = dma.hbm_to_vmem [thread:$0]  %s378_s0, 256, %s20_s16, [#allocation4], %s291_s25, %s291_s25, %s292_s26  }
  0x13   :  { %284 = dma.done.wait [#allocation4], 256  }
  0x14   :  { %285 = vsyncadd [#allocation4], 4294967040  ;;  %v201_v0 = vld [vmem:[%s379_s1] ss:$0 sm:$0xff]  ;;  %vm47_vm0 = vcmask 261120   ;;  %v336_v2 = vld [vmem:[#allocation3 + $0x8] sm:$0xff]  ;;  %v59_v7 = vlaneseq  ;;  %v54_v10 = vstv %s380_s2 }
  0x15   :  { %v37_v1 = vld [vmem:[#allocation3] sm:$0xff]  ;;  %v46_v4 = vmul.f32 %v201_v0, %v336_v2  ;;  %vm69_vm1 = vcmask 1041409   ;;  %vm72_vm2 = vcmask 58368   ;;  %v293_v20 = vmov 0   ;;  %s294_s1 = smov [#allocation7]  }
  0x16   :  { %v45_v3 = vmul.f32 %v201_v0, %v37_v1  ;;  %v60_v8 = vand.u32 127, %v59_v7  ;;  %v62_v9 = vshrl.u32 %v59_v7, 7  ;;  %209 = vset.pattern.permute.xlu0 %v293_v20  ;;  %208 = vset.pattern.permute.xlu1 %v293_v20  ;;  %s188_s2 = sshll.u32 %s294_s1, 4  ;;  %s189_s2 = int_to_ptr.vmem [resolvable:$true] %s188_s2 }
  0x17   :  { %v51_v6 = vsel %vm47_vm0, %v46_v4, 0.0  ;;  %s240_s6 = scalar_lea.vmem %s189_s2, 32  ;;  %p245_p9 = scmp.lt.s32.totalorder %s189_s2, %s189_s2 }
  0x18   :  { %v48_v5 = vsel %vm47_vm0, %v45_v3, 0.0  ;;  %v63_v12 = vsub.s32 %v60_v8, %v62_v9  ;;  %v79_v21 = vsub.s32 0, %v62_v9  ;;  %v83_v22 = vsub.s32 1, %v62_v9  ;;  %p241_p8 = scmp.ne.s32.totalorder %s189_s2, %s240_s6  ;;  %p246_p10 = scmp.lt.s32.totalorder %s240_s6, %s240_s6 }
  0x19   :  { %49 = vadd.xlane.f32.xlu0 %v48_v5 }
  0x1a   :  { %p247_p11 = por %p246_p10, %p245_p9 }
  0x1c   :  { %p248_p12 = pnand %p247_p11, %p241_p8 }
  0x1d   :  { %52 = vadd.xlane.f32.xlu0 %v51_v6 }
  0xa6   :  { %v50_v11 = vpop.xlane.xlu0 %49 }
  0xa7   :  { %v55_v13 = vadd.f32 %v54_v10, %v50_v11 }
  0xa9   :  { %v64_v16 = vrot.slane %v55_v13, %v63_v12 }
  0xaa   :  { %v53_v14 = vpop.xlane.xlu0 %52 }
  0xab   :  { %v56_v15 = vadd.f32 %v54_v10, %v53_v14 }
  0xad   :  { %v68_v17 = vrot.slane %v56_v15, %v63_v12 }
  0xaf   :  { %v70_v18 = vsel %vm69_vm1, %v68_v17, %v64_v16 }
  0xb0   :  { %v73_v19 = vsel %vm72_vm2, %v70_v18, -inf }
  0xb1   :  { %74 = vmax.xlane.f32.xlu1 %v73_v19 }
 0x13e   :  { %v75_v23 = vpop.xlane.xlu1 %74 }
 0x13f   :  { %v80_v24 = vrot.slane %v75_v23, %v79_v21  ;;  %v84_v25 = vrot.slane %v75_v23, %v83_v22 }
 0x141   :  { %v87_v26 = vsub.f32 %v55_v13, %v80_v24  ;;  %v88_v27 = vsub.f32 %v56_v15, %v84_v25 }
 0x143   :  { %v89_v28 = vmul.f32 1.442695, %v87_v26  ;;  %v91_v29 = vmul.f32 1.442695, %v88_v27 }
 0x145   :  { %210 = vpow2.f32 %v89_v28 }
 0x146   :  { %212 = vpow2.f32 %v91_v29 }
 0x14f   :  { %v211_v30 = vpop.eup %210 }
 0x150   :  { %v213_v31 = vpop.eup %212  ;;  %96 = vperm.xlu1 %208, %v211_v30  }
 0x151   :  { %99 = vperm.xlu0 %209, %v213_v31  }
 0x1cf   :  { %v97_v32 = vpop.permute.xlu1 %96 }
 0x1d0   :  { %v100_v33 = vpop.permute.xlu0 %99  ;;  %v104_v34 = vrot.slane %v97_v32, %v63_v12 }
 0x1d1   :  { %v108_v35 = vrot.slane %v100_v33, %v63_v12 }
 0x1d3   :  { %v109_v36 = vsel %vm69_vm1, %v108_v35, %v104_v34 }
 0x1d4   :  { %v111_v37 = vsel %vm72_vm2, %v109_v36, 0.0 }
 0x1d5   :  { %112 = vadd.xlane.f32.xlu1 %v111_v37 }
 0x262   :  { %v113_v38 = vpop.xlane.xlu1 %112 }
 0x263   :  { %v118_v39 = vrot.slane %v113_v38, %v79_v21  ;;  %v122_v40 = vrot.slane %v113_v38, %v83_v22 }
 0x265   :  { %214 = vrcp.f32 %v118_v39 }
 0x266   :  { %216 = vrcp.f32 %v122_v40 }
 0x26f   :  { %v215_v41 = vpop.eup %214 }
 0x270   :  { %v126_v42 = vmul.f32 %v215_v41, %v211_v30  ;;  %v217_v43 = vpop.eup %216 }
 0x271   :  { %v128_v44 = vmul.f32 %v217_v43, %v213_v31 }
 0x272   :  { %131 = vperm.xlu0 %209, %v126_v42  }
 0x276   :  { %136 = vperm.xlu0 %209, %v128_v44  }
 0x2f1   :  { %v132_v45 = vpop.permute.xlu0 %131 }
 0x2f2   :  { %v139_v46 = vmul.f32 %v132_v45, %v37_v1  ;;  %v164_v50 = vrot.slane %v132_v45, %v63_v12 }
 0x2f4   :  { %v141_v47 = vsel %vm47_vm0, %v139_v46, 0.0 }
 0x2f5   :  { %v142_v48 = vrot.slane %v141_v47, 4  ;;  %v137_v49 = vpop.permute.xlu0 %136 }
 0x2f6   :  { %v140_v51 = vmul.f32 %v137_v49, %v336_v2  ;;  %v168_v52 = vrot.slane %v137_v49, %v63_v12 }
 0x2f7   :  { %v143_v53 = vadd.f32 %v142_v48, %v141_v47 }
 0x2f8   :  { %v148_v54 = vsel %vm47_vm0, %v140_v51, 0.0  ;;  %v169_v55 = vsel %vm69_vm1, %v168_v52, %v164_v50 }
 0x2f9   :  { %v144_v56 = vrot.slane %v143_v53, 2  ;;  %v149_v57 = vrot.slane %v148_v54, 4  ;;  %171 = vst.msk [vmem:[#allocation7] sm:$0x3] %vm72_vm2, %v169_v55 }
 0x2fa   :  { %251 = shalt.err (!%p248_p12)
}
 0x2fb   :  { %s252_s9 = scalar_lea.hbm %s382_s4, 32 }
 0x2fc   :  { %p253_p13 = scmp.ne.s32.totalorder %s382_s4, %s252_s9  ;;  %p256_p0 = scmp.lt.u32.totalorder %s252_s9, %s382_s4 }
 0x2fe   :  { %p258_p1 = pnand %p256_p0, %p253_p13 }
 0x300   :  { %261 = shalt.err (!%p258_p1)
}
 0x301   :  { %191 = dma.vmem_to_hbm [thread:$0]  %s189_s2, 32, %s382_s4, [#allocation8]   ;;  %v145_v58 = vadd.f32 %v144_v56, %v143_v53  ;;  %v150_v59 = vadd.f32 %v149_v57, %v148_v54  ;;  %vm159_vm3 = vcmask 254976  }
 0x302   :  { %s295_s16 = smov [#allocation6]  }
 0x303   :  { %v151_v60 = vrot.slane %v150_v59, 2  ;;  %v146_v61 = vrot.slane %v145_v58, 1  ;;  %s178_s17 = sshll.u32 %s295_s16, 4  ;;  %s179_s17 = int_to_ptr.vmem [resolvable:$true] %s178_s17 }
 0x304   :  { %s262_s18 = scalar_lea.vmem %s179_s17, 32  ;;  %p267_p3 = scmp.lt.s32.totalorder %s179_s17, %s179_s17 }
 0x305   :  { %v152_v62 = vadd.f32 %v151_v60, %v150_v59  ;;  %v147_v1 = vadd.f32 %v146_v61, %v145_v58  ;;  %p263_p2 = scmp.ne.s32.totalorder %s179_s17, %s262_s18  ;;  %p268_p4 = scmp.lt.s32.totalorder %s262_s18, %s262_s18 }
 0x307   :  { %v153_v63 = vrot.slane %v152_v62, 1  ;;  %p269_p5 = por %p268_p4, %p267_p3 }
 0x309   :  { %v154_v0 = vadd.f32 %v153_v63, %v152_v62  ;;  %p270_p6 = pnand %p269_p5, %p263_p2 }
 0x30b   :  { %v157_v2 = vsel %vm69_vm1, %v154_v0, %v147_v1 }
 0x30c   :  { %160 = vst.msk [vmem:[#allocation6] sm:$0x3] %vm159_vm3, %v157_v2 }
 0x30d   :  { %273 = shalt.err (!%p270_p6)
}
 0x30e   :  { %s274_s20 = scalar_lea.hbm %s381_s3, 32 }
 0x30f   :  { %p275_p7 = scmp.ne.s32.totalorder %s381_s3, %s274_s20  ;;  %p278_p8 = scmp.lt.u32.totalorder %s274_s20, %s381_s3 }
 0x311   :  { %p280_p9 = pnand %p278_p8, %p275_p7 }
 0x313   :  { %283 = shalt.err (!%p280_p9)
}
 0x314   :  { %181 = dma.vmem_to_hbm [thread:$0]  %s179_s17, 32, %s381_s3, [#allocation5]  }
 0x315   :  { %286 = dma.done.wait [#allocation5], 32  }
 0x316   :  { %287 = vsyncadd [#allocation5], 4294967264 }
 0x317   :  { %288 = dma.done.wait [#allocation8], 32  }
 0x318   :  { %289 = vsyncadd [#allocation8], 4294967264 }
 0x319   :  { %198 = vsyncpa [#allocation4], 1 }
 0x31a   :  { %199 = vsyncpa [#allocation5], 1 }
 0x31b   :  { %200 = vsyncpa [#allocation8], 1 }

</bundles_post_ra>
